<compile_context>
chip_gen: v6e
topology: v6e:2x2x1
jax: 0.10.0
libtpu: 0.0.40
codegen_flags: <defaults>
</compile_context>

<pallas_src>
import jax
import jax.numpy as jnp
from jax.experimental import pallas as pl
from jax.experimental.pallas import tpu as pltpu


def _repeat_time_kernel(x_ref, o_ref):
    # x_ref: (TILE_NC, HW) input slab; o_ref: (TILE_NC, T, HW) output slab.
    # One sublane-broadcast per grid step; pure vld/vst stream otherwise.
    o_ref[...] = jnp.broadcast_to(x_ref[...][:, None, :], o_ref.shape)


def _choose_tile_nc(nc: int, hw: int, ntimes: int, dtype_size: int,
                    out_block_budget_bytes: int = 4 * 1024 * 1024) -> int:
    """Pick TILE_NC so the (TILE_NC, T, HW) output block stays ~<= 4 MiB.

    With double buffering of input + output this keeps total pipeline VMEM
    under ~12 MiB, safe against the smallest default scoped limit (v5e 16 MiB)
    and well inside v7x's 64 MiB physical VMEM.
    """
    row_bytes = ntimes * hw * dtype_size
    tile = max(1, out_block_budget_bytes // max(1, row_bytes))
    if tile >= nc:
        return nc
    # When not the full extent, keep the sublane dim a multiple of 8.
    tile = max(8, (tile // 8) * 8)
    return min(tile, nc)


def _repeat_time_pallas(x_flat: jax.Array, ntimes: int) -> jax.Array:
    """x_flat: (NC, HW) -> (NC, T, HW), broadcasting along T in-kernel."""
    NC, HW = x_flat.shape
    dsize = jnp.dtype(x_flat.dtype).itemsize
    tile_nc = _choose_tile_nc(NC, HW, ntimes, dsize)
    grid = (pl.cdiv(NC, tile_nc),)

    out_shape = jax.ShapeDtypeStruct((NC, ntimes, HW), x_flat.dtype)
    bytes_accessed = NC * HW * dsize * (1 + ntimes)  # read once, write T copies

    return pl.pallas_call(
        _repeat_time_kernel,
        out_shape=out_shape,
        grid=grid,
        in_specs=[
            # (TILE_NC, HW): HW is the full (lane-dense) minor dim.
            pl.BlockSpec((tile_nc, HW), lambda i: (i, 0)),
        ],
        # (TILE_NC, T, HW): full T extent and full lane-dense HW per block.
        out_specs=pl.BlockSpec((tile_nc, ntimes, HW), lambda i: (i, 0, 0)),
        compiler_params=pltpu.CompilerParams(
            # Shards the NC axis across TensorCores on v7x; no-op on v5e/v6e.
            dimension_semantics=("parallel",),
        ),
        cost_estimate=pl.CostEstimate(
            flops=0, transcendentals=0, bytes_accessed=int(bytes_accessed)),
    )(x_flat)


def pad_im2video(x: jax.Array, ntimes: int, pad_type: str = "repeat",
                 time_dim: int = 2) -> jax.Array:
    """JAX/Pallas equivalent of PadIm2Video.forward.

    4-D input (N, C, H, W) -> unsqueeze time axis at `time_dim`; if the time
    extent is 1 and pad_type == 'repeat', repeat it `ntimes` times. 5-D inputs
    with time > 1 pass through unchanged.
    """
    assert ntimes > 0
    assert pad_type in ("zero", "repeat")

    # Im2Video: add the time dimension if the input is an image batch.
    if x.ndim == 4:
        x = jnp.expand_dims(x, axis=time_dim)
    elif x.ndim != 5:
        raise ValueError(f"Dimension incorrect {x.shape}")

    if x.shape[time_dim] == 1:
        if pad_type == "repeat":
            # Kernel implemented for the module's default time_dim=2 (NCTHW).
            assert time_dim == 2, "kernel implemented for time_dim=2 (NCTHW)"
            N, C, _, H, W = x.shape
            # Glue reshapes only: (N,C,1,H,W) -> (N*C, H*W); lane-dense minor dim.
            x_flat = x.reshape(N * C, H * W)
            out = _repeat_time_pallas(x_flat, ntimes)      # (N*C, T, H*W)
            return out.reshape(N, C, ntimes, H, W)
        elif pad_type == "zero":
            # TODO(synk): 'zero' pad_type raises NotImplemented in the reference module too.
            raise NotImplementedError("zero pad_type not implemented (matches reference)")
    # time dimension already > 1: pass through (reference returns x unchanged).
    return x


if __name__ == "__main__":
    key = jax.random.PRNGKey(0)
    N, C, H, W = 2, 4, 16, 16
    ntimes = 2

    x = jax.random.normal(key, (N, C, H, W), dtype=jnp.float32)

    out = pad_im2video(x, ntimes=ntimes, pad_type="repeat", time_dim=2)
    out = jax.block_until_ready(out)

    # Correctness check against the pure-JAX reference of the PyTorch semantics.
    ref = jnp.repeat(jnp.expand_dims(x, 2), ntimes, axis=2)
    assert out.shape == (N, C, ntimes, H, W), out.shape
    assert out.dtype == x.dtype
    assert jnp.array_equal(out, ref)

    # Also exercise the pass-through path (5-D input with T > 1).
    x5 = jax.random.normal(key, (N, C, 3, H, W), dtype=jnp.float32)
    out5 = pad_im2video(x5, ntimes=ntimes, pad_type="repeat", time_dim=2)
    assert jnp.array_equal(out5, x5)

    print("KERNEL_OK")
</pallas_src>

<mosaic_0001>
module attributes {stable_mosaic.version = 11 : i64} {
  func.func @_repeat_time_kernel(%arg0: i32, %arg1: memref<8x256xf32, #tpu.memory_space<vmem>>, %arg2: memref<8x2x256xf32, #tpu.memory_space<vmem>>) attributes {dimension_semantics = [#tpu.dimension_semantics<parallel>], iteration_bounds = array<i64: 1>, scalar_prefetch = 0 : i64, scratch_operands = 0 : i64, tpu.core_type = #tpu.core_type<tc>, window_params = [{transform_indices = @transform_0, window_bounds = array<i64: 8, 256>}, {transform_indices = @transform_1, window_bounds = array<i64: 8, 2, 256>}]} {
    %c0 = arith.constant 0 : index
    %c0_0 = arith.constant 0 : index
    %0 = vector.load %arg1[%c0, %c0_0] : memref<8x256xf32, #tpu.memory_space<vmem>>, vector<8x256xf32>
    %1 = vector.shape_cast %0 : vector<8x256xf32> to vector<8x1x256xf32>
    %2 = vector.shape_cast %1 : vector<8x1x256xf32> to vector<8x1x256xf32>
    %3 = vector.broadcast %2 : vector<8x1x256xf32> to vector<8x2x256xf32>
    %c0_1 = arith.constant 0 : index
    %c0_2 = arith.constant 0 : index
    %c0_3 = arith.constant 0 : index
    %4 = vector.load %arg2[%c0_1, %c0_2, %c0_3] : memref<8x2x256xf32, #tpu.memory_space<vmem>>, vector<8x2x256xf32>
    tpu.vector_store %arg2[%c0_1, %c0_2, %c0_3], %3 {strides = array<i32>} : memref<8x2x256xf32, #tpu.memory_space<vmem>>, vector<8x2x256xf32>,
    return
  }
  func.func @transform_0(%arg0: i32) -> (i32, i32) {
    %c0_i32 = arith.constant 0 : i32
    %c0_i32_0 = arith.constant 0 : i32
    return %arg0, %c0_i32 : i32, i32
  }
  func.func @transform_1(%arg0: i32) -> (i32, i32, i32) {
    %c0_i32 = arith.constant 0 : i32
    %c0_i32_0 = arith.constant 0 : i32
    %c0_i32_1 = arith.constant 0 : i32
    return %arg0, %c0_i32, %c0_i32_0 : i32, i32, i32
  }
}

</mosaic_0001>

<bundles_post_ra>
// kernel: tpu_custom_call.1
= control target key start
LH: loop header
LB: loop body
LE: loop exit
PB: predicated region body
PF: predicated region fallthrough
CT: control target
= control target key end

     0   :  { %6 = vsyncpa [#allocation3], 0  ;;  %s316_s0 = inlined_call_operand.hbm [shape: f32[8,256], index: 0, kind: input, shape index: {}]   ;;  %s317_s1 = inlined_call_operand.hbm [shape: f32[8,2,256], index: 1, kind: output, shape index: {}]  }
   0x1   :  { %7 = vsyncpa [#allocation4], 0  ;;  %s295_s6 = smov [#allocation2]  }
   0x2   :  { %s14_s7 = sshll.u32 %s295_s6, 4  ;;  %s15_s7 = int_to_ptr.vmem [resolvable:$true] %s14_s7 }
   0x3   :  { %s259_s8 = scalar_lea.vmem %s15_s7, 256  ;;  %p264_p1 = scmp.lt.s32.totalorder %s15_s7, %s15_s7 }
   0x4   :  { %p260_p0 = scmp.ne.s32.totalorder %s15_s7, %s259_s8  ;;  %p265_p2 = scmp.lt.s32.totalorder %s259_s8, %s259_s8 }
   0x6   :  { %p266_p3 = por %p265_p2, %p264_p1 }
   0x8   :  { %p267_p4 = pnand %p266_p3, %p260_p0 }
   0xa   :  { %270 = shalt.err (!%p267_p4)
}
   0xb   :  { %17 = dma.hbm_to_vmem [thread:$0]  %s316_s0, 256, %s15_s7, [#allocation3]  }
   0xc   :  { %291 = dma.done.wait [#allocation3], 256  }
   0xd   :  { %292 = vsyncadd [#allocation3], 4294967040  ;;  %v30_v0 = vlaneseq  ;;  %v296_v1 = vmov 1966171168   ;;  %v21_v6 = vld [vmem:[#allocation2] sm:$0xff]  ;;  %v22_v7 = vld [vmem:[#allocation2 + $0x8] sm:$0xff] }
   0xe   :  { %v28_v2 = vunpack.c.l.s4 %v296_v1  ;;  %v249_v8 = vld [vmem:[#allocation2] ss:$8 sps:$4 sm:$0xff]   ;;  %v26_v9 = vcombine.high %v21_v6, %v22_v7  ;;  %s297_s0 = smov [#allocation5]  }
   0xf   :  { %v31_v3 = vshrl.u32 %v30_v0, 7  ;;  %s224_s11 = sshll.u32 %s297_s0, 4  ;;  %s225_s11 = int_to_ptr.vmem [resolvable:$true] %s224_s11 }
  0x10   :  { %v29_v4 = vunpack.c.0.s8 %v28_v2  ;;  %s271_s12 = scalar_lea.vmem %s225_s11, 512  ;;  %p276_p6 = scmp.lt.s32.totalorder %s225_s11, %s225_s11 }
  0x11   :  { %v77_v11 = vsub.s32 0, %v31_v3  ;;  %v81_v12 = vsub.s32 1, %v31_v3  ;;  %p272_p5 = scmp.ne.s32.totalorder %s225_s11, %s271_s12  ;;  %p277_p7 = scmp.lt.s32.totalorder %s271_s12, %s271_s12 }
  0x12   :  { %v32_v5 = vsub.s32 %v29_v4, %v31_v3 }
  0x13   :  { %p278_p8 = por %p277_p7, %p276_p6 }
  0x14   :  { %v33_v10 = vrot.slane %v249_v8, %v32_v5  ;;  %v40_v13 = vrot.slane %v26_v9, %v32_v5 }
  0x15   :  { %p279_p9 = pnand %p278_p8, %p272_p5 }
  0x16   :  { %v49_v14 = vrot.slane %v33_v10, %v32_v5  ;;  %v41_v15 = vcombine.high %v33_v10, %v33_v10  ;;  %v56_v16 = vrot.slane %v40_v13, %v32_v5  ;;  %v42_v17 = vcombine.high %v40_v13, %v40_v13 }
  0x18   :  { %v78_v18 = vrot.slane %v49_v14, %v77_v11  ;;  %v82_v19 = vrot.slane %v49_v14, %v81_v12  ;;  %v63_v20 = vrot.slane %v41_v15, %v32_v5  ;;  %v71_v21 = vcombine.high %v49_v14, %v49_v14 }
  0x19   :  { %v110_v22 = vrot.slane %v56_v16, %v77_v11  ;;  %v114_v23 = vrot.slane %v56_v16, %v81_v12  ;;  %v70_v24 = vrot.slane %v42_v17, %v32_v5  ;;  %v72_v25 = vcombine.high %v56_v16, %v56_v16 }
  0x1a   :  { %v139_v26 = vcombine.low %v78_v18, %v82_v19  ;;  %v86_v27 = vrot.slane %v63_v20, %v77_v11  ;;  %v90_v28 = vrot.slane %v63_v20, %v81_v12  ;;  %v94_v29 = vrot.slane %v71_v21, %v77_v11 }
  0x1b   :  { %v98_v30 = vrot.slane %v71_v21, %v81_v12  ;;  %v73_v31 = vcombine.high %v63_v20, %v63_v20  ;;  %v171_v32 = vcombine.low %v110_v22, %v114_v23  ;;  %v118_v33 = vrot.slane %v70_v24, %v77_v11 }
  0x1c   :  { %236 = vst.sshfl [vmem:[#allocation5] sm:$0x33 pattern:$0x76325410] %v139_v26  ;;  %v147_v34 = vcombine.low %v86_v27, %v90_v28  ;;  %v122_v35 = vrot.slane %v70_v24, %v81_v12  ;;  %v126_v36 = vrot.slane %v72_v25, %v77_v11  ;;  %v130_v37 = vrot.slane %v72_v25, %v81_v12 }
  0x1d   :  { %v155_v38 = vcombine.low %v94_v29, %v98_v30  ;;  %v102_v39 = vrot.slane %v73_v31, %v77_v11  ;;  %v106_v40 = vrot.slane %v73_v31, %v81_v12  ;;  %240 = vst.sshfl [vmem:[#allocation5 + $0x10] sm:$0x33 pattern:$0x76325410] %v171_v32  ;;  %v74_v41 = vcombine.high %v70_v24, %v70_v24 }
  0x1e   :  { %237 = vst.sshfl [vmem:[#allocation5 + $0x4] sm:$0x33 pattern:$0x76325410] %v147_v34  ;;  %v179_v42 = vcombine.low %v118_v33, %v122_v35  ;;  %v187_v43 = vcombine.low %v126_v36, %v130_v37 }
  0x1f   :  { %238 = vst.sshfl [vmem:[#allocation5 + $0x8] sm:$0x33 pattern:$0x76325410] %v155_v38  ;;  %v163_v44 = vcombine.low %v102_v39, %v106_v40  ;;  %v134_v45 = vrot.slane %v74_v41, %v77_v11  ;;  %v138_v46 = vrot.slane %v74_v41, %v81_v12 }
  0x20   :  { %241 = vst.sshfl [vmem:[#allocation5 + $0x14] sm:$0x33 pattern:$0x76325410] %v179_v42 }
  0x21   :  { %242 = vst.sshfl [vmem:[#allocation5 + $0x18] sm:$0x33 pattern:$0x76325410] %v187_v43  ;;  %v195_v47 = vcombine.low %v134_v45, %v138_v46 }
  0x22   :  { %239 = vst.sshfl [vmem:[#allocation5 + $0xc] sm:$0x33 pattern:$0x76325410] %v163_v44 }
  0x23   :  { %243 = vst.sshfl [vmem:[#allocation5 + $0x1c] sm:$0x33 pattern:$0x76325410] %v195_v47 }
  0x24   :  { %282 = shalt.err (!%p279_p9)
}
  0x25   :  { %s298_s13 = smov 64   ;;  %s299_s14 = smov 4  }
  0x26   :  { %230 = dma.vmem_to_hbm [thread:$0]  %s225_s11, 512, %s317_s1, [#allocation4], %s298_s13, %s298_s13, %s299_s14  }
  0x27   :  { %293 = dma.done.wait [#allocation4], 512  }
  0x28   :  { %294 = vsyncadd [#allocation4], 4294966784 }
  0x29   :  { %234 = vsyncpa [#allocation3], 1 }
  0x2a   :  { %235 = vsyncpa [#allocation4], 1 }

</bundles_post_ra>
